<compile_context>
chip_gen: v5e
topology: v5e:2x2
jax: 0.10.0
libtpu: 0.0.40
codegen_flags: <defaults>
</compile_context>

<pallas_src>
import functools

import jax
import jax.numpy as jnp
from jax.experimental import pallas as pl
from jax.experimental.pallas import tpu as pltpu

_LANE = 128
_EPS = 1e-5


def _round_up(x, m):
    return (x + m - 1) // m * m


def _vmem_limit(need_bytes):
    try:
        info = pltpu.get_tpu_info()
        cap = int(getattr(info, "vmem_capacity_bytes", 64 << 20))
    except Exception:
        cap = 64 << 20  # conservative fallback: v7x per-TensorCore VMEM
    return int(min(max(int(need_bytes), 32 << 20), int(cap * 0.85)))


# --------------------------------------------------------------------------- #
# Kernels
# --------------------------------------------------------------------------- #
def _sage_layer_kernel(a_ref, invdeg_ref, z_ref, ws_ref, wn_ref,
                       h_ref, stats_ref, *, tm):
    """One row tile of SAGEConv('mean') plus per-tile BN partial statistics.

    a_ref:      (TM, Np)   int8 0/1 adjacency rows of this tile
    invdeg_ref: (TM, 1)    f32  1/in_degree (0 for zero-in-degree / padded rows)
    z_ref:      (Np, Fin)  bf16 node features (resident; padded rows are zero)
    ws/wn_ref:  (Fin, Fout) bf16 self / neighbour weights
    h_ref:      (TM, Fout) f32  raw (pre-BN, bias-free) layer output tile
    stats_ref:  (1, 2, Fout) f32 per-tile [sum, sum-of-squares] partials
    """
    a = a_ref[...].astype(jnp.bfloat16)          # 0/1 values, exact in bf16
    z = z_ref[...]
    # mean-neighbour aggregation: exact 0/1 matmul, f32 inv-degree post-scale.
    agg = jnp.dot(a, z, preferred_element_type=jnp.float32) * invdeg_ref[...]
    # self rows of Z for this tile (aligned dynamic slice of the resident block).
    row0 = pl.multiple_of(pl.program_id(0) * tm, tm)
    z_self = z_ref[pl.ds(row0, tm), :]
    h = (jnp.dot(z_self, ws_ref[...], preferred_element_type=jnp.float32)
         + jnp.dot(agg.astype(jnp.bfloat16), wn_ref[...],
                   preferred_element_type=jnp.float32))
    h_ref[...] = h
    # Padded node rows of h are exactly zero (zero features, zero inv_deg), so the
    # partial sums need no row mask.
    s = jnp.sum(h, axis=0, keepdims=True)
    q = jnp.sum(h * h, axis=0, keepdims=True)
    stats_ref[...] = jnp.concatenate([s, q], axis=0)[None]


def _bn_act_kernel(h_ref, bn_ref, o_ref, *, tm, n, relu):
    """Apply the folded BatchNorm affine (scale, shift) (+ optional ReLU) to one tile,
    zeroing padded node rows so they stay inert for the next layer's statistics."""
    y = h_ref[...] * bn_ref[0:1, :] + bn_ref[1:2, :]
    if relu:
        y = jnp.maximum(y, 0.0)
    row = pl.program_id(0) * tm + jax.lax.broadcasted_iota(jnp.int32, (tm, 1), 0)
    y = jnp.where(row < n, y, 0.0)
    o_ref[...] = y.astype(o_ref.dtype)


# --------------------------------------------------------------------------- #
# pallas_call wrappers
# --------------------------------------------------------------------------- #
def _sage_layer(a01, inv_deg, z, ws, wn, *, tm):
    np_, fin = z.shape
    fout = ws.shape[1]
    ntiles = np_ // tm

    flops = 2 * np_ * np_ * fin + 4 * np_ * fin * fout
    bytes_accessed = np_ * np_ + np_ * fin * 2 + 4 * fin * fout + np_ * fout * 4
    need = (2 * tm * np_                 # int8 A row tiles (double-buffered)
            + 2 * np_ * fin * 2          # resident Z (counted twice for buffering)
            + 4 * fin * fout * 2         # Ws + Wn
            + 2 * tm * fout * 4          # output tiles
            + 4 * tm * np_ + 4 * tm * fin  # in-kernel bf16-A / f32-agg temps
            + (4 << 20))

    h, stats = pl.pallas_call(
        functools.partial(_sage_layer_kernel, tm=tm),
        grid=(ntiles,),
        in_specs=[
            pl.BlockSpec((tm, np_), lambda i: (i, 0)),      # A row tile (int8)
            pl.BlockSpec((tm, 1), lambda i: (i, 0)),        # inv_deg tile
            pl.BlockSpec((np_, fin), lambda i: (0, 0)),     # Z (resident)
            pl.BlockSpec((fin, fout), lambda i: (0, 0)),    # W_self
            pl.BlockSpec((fin, fout), lambda i: (0, 0)),    # W_neigh
        ],
        out_specs=(
            pl.BlockSpec((tm, fout), lambda i: (i, 0)),
            pl.BlockSpec((1, 2, fout), lambda i: (i, 0, 0)),
        ),
        out_shape=(
            jax.ShapeDtypeStruct((np_, fout), jnp.float32),
            jax.ShapeDtypeStruct((ntiles, 2, fout), jnp.float32),
        ),
        compiler_params=pltpu.CompilerParams(
            dimension_semantics=("parallel",),
            vmem_limit_bytes=_vmem_limit(2 * need)),
        cost_estimate=pl.CostEstimate(flops=int(flops), transcendentals=0,
                                      bytes_accessed=int(bytes_accessed)),
    )(a01, inv_deg, z, ws, wn)
    return h, stats


def _bn_act(h, bn, *, tm, n, relu, out_dtype):
    np_, f = h.shape
    ntiles = np_ // tm
    need = 2 * tm * f * 8 + 4 * f * 4 + (4 << 20)
    return pl.pallas_call(
        functools.partial(_bn_act_kernel, tm=tm, n=n, relu=relu),
        grid=(ntiles,),
        in_specs=[pl.BlockSpec((tm, f), lambda i: (i, 0)),
                  pl.BlockSpec((2, f), lambda i: (0, 0))],
        out_specs=pl.BlockSpec((tm, f), lambda i: (i, 0)),
        out_shape=jax.ShapeDtypeStruct((np_, f), out_dtype),
        compiler_params=pltpu.CompilerParams(
            dimension_semantics=("parallel",),
            vmem_limit_bytes=_vmem_limit(need)),
    )(h, bn)


def _fold_bn(stats, gamma, beta, n_real, f_pad):
    """Reduce per-tile partials to folded BN scale/shift (training-mode, biased var)."""
    s = jnp.sum(stats[:, 0, :], axis=0)
    q = jnp.sum(stats[:, 1, :], axis=0)
    mu = s / n_real
    var = jnp.maximum(q / n_real - mu * mu, 0.0)
    rstd = jax.lax.rsqrt(var + _EPS)
    g = jnp.zeros((f_pad,), jnp.float32).at[:gamma.size].set(gamma.reshape(-1))
    b = jnp.zeros((f_pad,), jnp.float32).at[:beta.size].set(beta.reshape(-1))
    scale = g * rstd
    shift = b - mu * scale
    return jnp.stack([scale, shift], axis=0)          # (2, f_pad)


def prepare_graph(adj, n_pad):
    """Pack the dense adjacency once (callers should cache this across forward calls):
    padded int8 0/1 adjacency and padded f32 1/in_degree column."""
    n = adj.shape[0]
    a01 = (adj > 0).astype(jnp.int8)
    deg = jnp.sum(a01.astype(jnp.float32), axis=1, keepdims=True)
    inv_deg = jnp.where(deg > 0, 1.0 / jnp.maximum(deg, 1.0), 0.0)
    a01_p = jnp.zeros((n_pad, n_pad), jnp.int8).at[:n, :n].set(a01)
    inv_p = jnp.zeros((n_pad, 1), jnp.float32).at[:n, :].set(inv_deg)
    return a01_p, inv_p


def graphsage_forward(adj, X, params):
    """GraphSAGE forward: SAGEConv -> BN -> ReLU -> SAGEConv -> BN."""
    N, F = X.shape
    H = params["w_self1"].shape[1]
    O = params["w_self2"].shape[1]

    # Node dim padded to a lane-dense multiple of 128; row-tile size TM is the largest
    # divisor of Np in {512, 384, 256, 128} whose double-buffered int8 A tile stays
    # under ~16 MiB.
    Np = _round_up(N, _LANE)
    TM = _LANE
    for cand in (512, 384, 256):
        if Np % cand == 0 and 2 * cand * Np <= (16 << 20):
            TM = cand
            break
    Fp, Hp, Op = (_round_up(d, _LANE) for d in (F, H, O))
    bf16 = jnp.bfloat16

    # TODO(synk): adjacency/feature padding should be cached by the caller across
    # repeated forward calls (otherwise it adds an extra N^2 HBM round trip).
    a01, inv_deg = prepare_graph(adj, Np)
    x_p = jnp.zeros((Np, Fp), bf16).at[:N, :F].set(X.astype(bf16))

    def pad_w(w, fin_p, fout_p):
        fin, fout = w.shape
        return jnp.zeros((fin_p, fout_p), bf16).at[:fin, :fout].set(w.astype(bf16))

    w1s, w1n = pad_w(params["w_self1"], Fp, Hp), pad_w(params["w_neigh1"], Fp, Hp)
    w2s, w2n = pad_w(params["w_self2"], Hp, Op), pad_w(params["w_neigh2"], Hp, Op)

    # ----- SAGEConv 1 (+ BN partial stats)  ->  BN1 + ReLU -----
    h1, stats1 = _sage_layer(a01, inv_deg, x_p, w1s, w1n, tm=TM)
    bn1 = _fold_bn(stats1, params["gamma1"], params["beta1"], N, Hp)
    z1 = _bn_act(h1, bn1, tm=TM, n=N, relu=True, out_dtype=bf16)

    # ----- SAGEConv 2 (+ BN partial stats)  ->  BN2 -----
    # TODO(synk): when (unpadded) hidden >> out, a pre-projection pass (z1 @ w2n)
    # would shrink the N^2 aggregation term; with both padded to 128 here,
    # aggregate-then-project is already optimal.
    h2, stats2 = _sage_layer(a01, inv_deg, z1, w2s, w2n, tm=TM)
    bn2 = _fold_bn(stats2, params["gamma2"], params["beta2"], N, Op)
    out = _bn_act(h2, bn2, tm=TM, n=N, relu=False, out_dtype=jnp.float32)

    # TODO(synk): BN running_mean/running_var updates are training-side bookkeeping and
    # are not produced here; the bias-free SAGE layers rely on training-mode BN (batch
    # statistics) immediately following each layer — eval-mode BN would not cancel the
    # SAGEConv biases.
    # TODO(synk): for node counts where a (TM, Np) adjacency row tile plus the resident
    # feature matrix no longer fit VMEM, the contraction dim also needs tiling (second
    # grid axis with an accumulator scratch).
    return out[:N, :O]


def graphsage_reference(adj, X, params):
    """Pure-JAX reference mirroring the kernel's math (same bf16 casts / aggregation)."""
    bf16, f32 = jnp.bfloat16, jnp.float32
    a01 = (adj > 0).astype(f32)
    deg = jnp.sum(a01, axis=1, keepdims=True)
    inv_deg = jnp.where(deg > 0, 1.0 / jnp.maximum(deg, 1.0), 0.0)
    ab = a01.astype(bf16)

    def bn(h, g, b):
        mu = jnp.mean(h, axis=0, keepdims=True)
        var = jnp.mean((h - mu) ** 2, axis=0, keepdims=True)
        return (h - mu) * jax.lax.rsqrt(var + _EPS) * g.reshape(1, -1) + b.reshape(1, -1)

    def sage(z, ws, wn):
        agg = (jnp.dot(ab, z, preferred_element_type=f32) * inv_deg).astype(bf16)
        return (jnp.dot(z, ws.astype(bf16), preferred_element_type=f32)
                + jnp.dot(agg, wn.astype(bf16), preferred_element_type=f32))

    h = sage(X.astype(bf16), params["w_self1"], params["w_neigh1"])
    h = jnp.maximum(bn(h, params["gamma1"], params["beta1"]), 0.0)
    h2 = sage(h.astype(bf16), params["w_self2"], params["w_neigh2"])
    return bn(h2, params["gamma2"], params["beta2"])


def xavier_uniform(key, fan_in, fan_out):
    bound = (6.0 / (fan_in + fan_out)) ** 0.5
    return jax.random.uniform(key, (fan_in, fan_out), jnp.float32, -bound, bound)


if __name__ == "__main__":
    key = jax.random.PRNGKey(0)
    N, in_feats, hidden_feats, out_feats = 8, 16, 32, 8
    k_adj, k_x, k1, k2, k3, k4 = jax.random.split(key, 6)

    # Deterministic random directed graph: adj[v, u] = 1 iff there is an edge u -> v.
    adj = (jax.random.uniform(k_adj, (N, N)) < 0.4).astype(jnp.float32)
    X = jax.random.normal(k_x, (N, in_feats), dtype=jnp.float32)

    params = {
        # SAGEConv 1 (xavier weights; biases omitted — zero-initialized in the module
        # and cancelled exactly by the following training-mode BatchNorm either way)
        "w_self1":  xavier_uniform(k1, in_feats, hidden_feats),
        "w_neigh1": xavier_uniform(k2, in_feats, hidden_feats),
        "gamma1":   jnp.ones((hidden_feats,), jnp.float32),
        "beta1":    jnp.zeros((hidden_feats,), jnp.float32),
        # SAGEConv 2
        "w_self2":  xavier_uniform(k3, hidden_feats, out_feats),
        "w_neigh2": xavier_uniform(k4, hidden_feats, out_feats),
        "gamma2":   jnp.ones((out_feats,), jnp.float32),
        "beta2":    jnp.zeros((out_feats,), jnp.float32),
    }

    out = graphsage_forward(adj, X, params)
    jax.block_until_ready(out)
    ref = graphsage_reference(adj, X, params)

    assert out.shape == (N, out_feats)
    assert bool(jnp.all(jnp.isfinite(out)))
    assert float(jnp.max(jnp.abs(out - ref))) < 5e-2
    print("KERNEL_OK")
</pallas_src>

<mosaic_0001>
module attributes {stable_mosaic.version = 11 : i64} {
  func.func @_sage_layer_kernel(%arg0: i32, %arg1: memref<128x128xi8, #tpu.memory_space<vmem>>, %arg2: memref<128x1xf32, #tpu.memory_space<vmem>>, %arg3: memref<128x128xbf16, #tpu.memory_space<vmem>>, %arg4: memref<128x128xbf16, #tpu.memory_space<vmem>>, %arg5: memref<128x128xbf16, #tpu.memory_space<vmem>>, %arg6: memref<128x128xf32, #tpu.memory_space<vmem>>, %arg7: memref<1x2x128xf32, #tpu.memory_space<vmem>>) attributes {dimension_semantics = [#tpu.dimension_semantics<parallel>], iteration_bounds = array<i64: 1>, scalar_prefetch = 0 : i64, scratch_operands = 0 : i64, tpu.core_type = #tpu.core_type<tc>, window_params = [{transform_indices = @transform_0, window_bounds = array<i64: 128, 128>}, {transform_indices = @transform_1, window_bounds = array<i64: 128, 1>}, {pipeline_mode = #tpu.pipeline_mode<synchronous>, transform_indices = @transform_2, window_bounds = array<i64: 128, 128>}, {pipeline_mode = #tpu.pipeline_mode<synchronous>, transform_indices = @transform_3, window_bounds = array<i64: 128, 128>}, {pipeline_mode = #tpu.pipeline_mode<synchronous>, transform_indices = @transform_4, window_bounds = array<i64: 128, 128>}, {transform_indices = @transform_5, window_bounds = array<i64: 128, 128>}, {transform_indices = @transform_6, window_bounds = array<i64: 1, 2, 128>}]} {
    %c0 = arith.constant 0 : index
    %c0_0 = arith.constant 0 : index
    %0 = vector.load %arg1[%c0, %c0_0] : memref<128x128xi8, #tpu.memory_space<vmem>>, vector<128x128xi8>
    %1 = arith.sitofp %0 : vector<128x128xi8> to vector<128x128xbf16>
    %c0_1 = arith.constant 0 : index
    %c0_2 = arith.constant 0 : index
    %2 = vector.load %arg3[%c0_1, %c0_2] : memref<128x128xbf16, #tpu.memory_space<vmem>>, vector<128x128xbf16>
    %cst = arith.constant dense<0.000000e+00> : vector<128x128xf32>
    %3 = tpu.matmul %1, %2, %cst {dimension_numbers = #tpu.dot_dimension_numbers<[1], [0], [0], [1], [0, 0, 1, 1], [], []>} : vector<128x128xbf16>, vector<128x128xbf16>, vector<128x128xf32> -> vector<128x128xf32>
    %c0_3 = arith.constant 0 : index
    %c0_4 = arith.constant 0 : index
    %4 = vector.load %arg2[%c0_3, %c0_4] : memref<128x1xf32, #tpu.memory_space<vmem>>, vector<128x1xf32>
    %5 = vector.broadcast %4 : vector<128x1xf32> to vector<128x128xf32>
    %6 = arith.mulf %3, %5 : vector<128x128xf32>
    %c128_i32 = arith.constant 128 : i32
    %7 = arith.muli %arg0, %c128_i32 : i32
    %8 = tpu.assume_multiple %7, 128 : i32
    %9 = arith.index_cast %8 : i32 to index
    %c0_5 = arith.constant 0 : index
    %10 = vector.load %arg3[%9, %c0_5] : memref<128x128xbf16, #tpu.memory_space<vmem>>, vector<128x128xbf16>
    %c0_6 = arith.constant 0 : index
    %c0_7 = arith.constant 0 : index
    %11 = vector.load %arg4[%c0_6, %c0_7] : memref<128x128xbf16, #tpu.memory_space<vmem>>, vector<128x128xbf16>
    %cst_8 = arith.constant dense<0.000000e+00> : vector<128x128xf32>
    %12 = tpu.matmul %10, %11, %cst_8 {dimension_numbers = #tpu.dot_dimension_numbers<[1], [0], [0], [1], [0, 0, 1, 1], [], []>} : vector<128x128xbf16>, vector<128x128xbf16>, vector<128x128xf32> -> vector<128x128xf32>
    %13 = arith.truncf %6 : vector<128x128xf32> to vector<128x128xbf16>
    %c0_9 = arith.constant 0 : index
    %c0_10 = arith.constant 0 : index
    %14 = vector.load %arg5[%c0_9, %c0_10] : memref<128x128xbf16, #tpu.memory_space<vmem>>, vector<128x128xbf16>
    %cst_11 = arith.constant dense<0.000000e+00> : vector<128x128xf32>
    %15 = tpu.matmul %13, %14, %cst_11 {dimension_numbers = #tpu.dot_dimension_numbers<[1], [0], [0], [1], [0, 0, 1, 1], [], []>} : vector<128x128xbf16>, vector<128x128xbf16>, vector<128x128xf32> -> vector<128x128xf32>
    %16 = arith.addf %12, %15 : vector<128x128xf32>
    %c0_12 = arith.constant 0 : index
    %c0_13 = arith.constant 0 : index
    %17 = vector.load %arg6[%c0_12, %c0_13] : memref<128x128xf32, #tpu.memory_space<vmem>>, vector<128x128xf32>
    tpu.vector_store %arg6[%c0_12, %c0_13], %16 {strides = array<i32>} : memref<128x128xf32, #tpu.memory_space<vmem>>, vector<128x128xf32>,
    %cst_14 = arith.constant dense<0.000000e+00> : vector<128xf32>
    %18 = vector.multi_reduction <add>, %16, %cst_14 [0] : vector<128x128xf32> to vector<128xf32>
    %19 = vector.shape_cast %18 : vector<128xf32> to vector<1x128xf32>
    %20 = arith.mulf %16, %16 : vector<128x128xf32>
    %cst_15 = arith.constant dense<0.000000e+00> : vector<128xf32>
    %21 = vector.multi_reduction <add>, %20, %cst_15 [0] : vector<128x128xf32> to vector<128xf32>
    %22 = vector.shape_cast %21 : vector<128xf32> to vector<1x128xf32>
    %23 = tpu.concatenate %19, %22 in 0 : vector<1x128xf32>, vector<1x128xf32> -> vector<2x128xf32>
    %24 = vector.shape_cast %23 : vector<2x128xf32> to vector<1x2x128xf32>
    %c0_16 = arith.constant 0 : index
    %c0_17 = arith.constant 0 : index
    %c0_18 = arith.constant 0 : index
    %25 = vector.load %arg7[%c0_16, %c0_17, %c0_18] : memref<1x2x128xf32, #tpu.memory_space<vmem>>, vector<1x2x128xf32>
    tpu.vector_store %arg7[%c0_16, %c0_17, %c0_18], %24 {strides = array<i32>} : memref<1x2x128xf32, #tpu.memory_space<vmem>>, vector<1x2x128xf32>,
    return
  }
  func.func @transform_0(%arg0: i32) -> (i32, i32) {
    %c0_i32 = arith.constant 0 : i32
    %c0_i32_0 = arith.constant 0 : i32
    return %arg0, %c0_i32 : i32, i32
  }
  func.func @transform_1(%arg0: i32) -> (i32, i32) {
    %c0_i32 = arith.constant 0 : i32
    %c0_i32_0 = arith.constant 0 : i32
    return %arg0, %c0_i32 : i32, i32
  }
  func.func @transform_2(%arg0: i32) -> (i32, i32) {
    %c0_i32 = arith.constant 0 : i32
    %c0_i32_0 = arith.constant 0 : i32
    %c0_i32_1 = arith.constant 0 : i32
    return %c0_i32, %c0_i32_0 : i32, i32
  }
  func.func @transform_3(%arg0: i32) -> (i32, i32) {
    %c0_i32 = arith.constant 0 : i32
    %c0_i32_0 = arith.constant 0 : i32
    %c0_i32_1 = arith.constant 0 : i32
    return %c0_i32, %c0_i32_0 : i32, i32
  }
  func.func @transform_4(%arg0: i32) -> (i32, i32) {
    %c0_i32 = arith.constant 0 : i32
    %c0_i32_0 = arith.constant 0 : i32
    %c0_i32_1 = arith.constant 0 : i32
    return %c0_i32, %c0_i32_0 : i32, i32
  }
  func.func @transform_5(%arg0: i32) -> (i32, i32) {
    %c0_i32 = arith.constant 0 : i32
    %c0_i32_0 = arith.constant 0 : i32
    return %arg0, %c0_i32 : i32, i32
  }
  func.func @transform_6(%arg0: i32) -> (i32, i32, i32) {
    %c0_i32 = arith.constant 0 : i32
    %c0_i32_0 = arith.constant 0 : i32
    %c0_i32_1 = arith.constant 0 : i32
    return %arg0, %c0_i32, %c0_i32_0 : i32, i32, i32
  }
}

</mosaic_0001>

<bundles_post_ra>
// kernel: tpu_custom_call.1
= control target key start
LH: loop header
LB: loop body
LE: loop exit
PB: predicated region body
PF: predicated region fallthrough
CT: control target
= control target key end

     0   :  { %12 = vsyncpa [#allocation3], 0  ;;  %s1243_s0 = inlined_call_operand.hbm [shape: s8[128,128], index: 0, kind: input, shape index: {}]   ;;  %s1244_s1 = inlined_call_operand.vmem [shape: f32[128,1], index: 1, kind: input, shape index: {}]   ;;  %s1245_s2 = inlined_call_operand.vmem [shape: bf16[128,128], index: 2, kind: input, shape index: {}]   ;;  %s1246_s3 = inlined_call_operand.vmem [shape: bf16[128,128], index: 3, kind: input, shape index: {}]   ;;  %s1247_s4 = inlined_call_operand.hbm [shape: bf16[128,128], index: 4, kind: input, shape index: {}]   ;;  %s1248_s5 = inlined_call_operand.hbm [shape: f32[128,128], index: 5, kind: output, shape index: {0}]   ;;  %s1249_s6 = inlined_call_operand.hbm [shape: f32[1,2,128], index: 6, kind: output, shape index: {1}]  }
   0x1   :  { %13 = vsyncpa [#allocation6], 0 }
   0x2   :  { %14 = vsyncpa [#allocation4], 0 }
   0x3   :  { %15 = vsyncpa [#allocation9], 0  ;;  %s20_s23 = sshll.u32 %s1243_s0, 4  ;;  %s1043_s24 = smov [#allocation2]   ;;  %s21_s23 = int_to_ptr.hbm [resolvable:$true] %s20_s23 }
   0x4   :  { %s22_s25 = sshll.u32 %s1043_s24, 4  ;;  %s39_s28 = sshll.u32 %s1247_s4, 4  ;;  %s23_s25 = int_to_ptr.vmem [resolvable:$true] %s22_s25  ;;  %s40_s28 = int_to_ptr.hbm [resolvable:$true] %s39_s28 }
   0x5   :  { %s1044_s29 = smov 128   ;;  %s1045_s30 = smov 8  }
   0x6   :  { %28 = dma.hbm_to_vmem [thread:$0]  %s21_s23, 512, %s23_s25, [#allocation3], %s1044_s29, %s1044_s29, %s1045_s30  }
   0x7   :  { %s1046_s7 = smov [#allocation5]   ;;  %s1047_s9 = smov 64  }
   0x8   :  { %s41_s8 = sshll.u32 %s1046_s7, 4  ;;  %s1048_s0 = smov 4   ;;  %s42_s8 = int_to_ptr.vmem [resolvable:$true] %s41_s8 }
   0x9   :  { %47 = dma.hbm_to_vmem [thread:$0]  %s40_s28, 1024, %s42_s8, [#allocation6], %s1047_s9, %s1047_s9, %s1048_s0  }
   0xa   :  { %1035 = dma.done.wait [#allocation3], 512  }
   0xb   :  { %1036 = vsyncadd [#allocation3], 4294966784 }
   0xc   :  { %1037 = dma.done.wait [#allocation6], 1024  }
   0xd   :  { %1038 = vsyncadd [#allocation6], 4294966272  ;;  %v1049_v0 = vmov 0   ;;  %v878_v1 = vld [vmem:[%s1245_s2 + $0x38] sm:$0xff]  ;;  %v213_v2 = vld [vmem:[%s1244_s1] sm:$0xff]  ;;  %s711_s17 = sshll.u32 %s1248_s5, 4  ;;  %s712_s17 = int_to_ptr.hbm [resolvable:$true] %s711_s17 }
   0xe   :  { %936 = vset.pattern.permute.xlu0 %v1049_v0  ;;  %937 = vset.pattern.permute.xlu1 %v1049_v0  ;;  %v877_v3 = vld [vmem:[%s1245_s2 + $0x30] sm:$0xff]  ;;  %v876_v5 = vld [vmem:[%s1245_s2 + $0x28] sm:$0xff]  ;;  %v216_v7 = vld [vmem:[%s1244_s1 + $0x18] sm:$0xff]  ;;  %s1051_s5 = smov [#allocation8]   ;;  %s725_s19 = sshll.u32 %s1249_s6, 4  ;;  %vm702_vm0 = vcmask 1040384   ;;  %s726_s19 = int_to_ptr.hbm [resolvable:$true] %s725_s19 }
   0xf   :  { %938 = vset.pattern.permute.xlu2 %v1049_v0  ;;  %231 = vperm.xlu0 %936, %v213_v2   ;;  %v215_v4 = vld [vmem:[%s1244_s1 + $0x10] sm:$0xff]  ;;  %v214_v6 = vld [vmem:[%s1244_s1 + $0x8] sm:$0xff]  ;;  %v875_v8 = vld [vmem:[%s1245_s2 + $0x20] sm:$0xff] }
  0x10   :  { %164 = vmatpush.bf16.msra.mxu0 %v878_v1  ;;  %903 = vmatpush.bf16.msra.mxu3 %v878_v1  ;;  %v874_v9 = vld [vmem:[%s1245_s2 + $0x18] sm:$0xff]  ;;  %v225_v10 = vld [vmem:[%s1244_s1 + $0x60] sm:$0xff]  ;;  %v226_v11 = vld [vmem:[%s1244_s1 + $0x68] sm:$0xff] }
  0x11   :  { %241 = vperm.xlu1 %937, %v215_v4   ;;  %v873_v12 = vld [vmem:[%s1245_s2 + $0x10] sm:$0xff]  ;;  %v56_v13 = vld [vmem:[#allocation2] sm:$0xff]  ;;  %v59_v14 = vld [vmem:[#allocation2 + $0x18] sm:$0xff] }
  0x12   :  { %v60_v15 = vunpack.c.0.s8 %v56_v13  ;;  %v61_v16 = vunpack.c.1.s8 %v56_v13  ;;  %v72_v17 = vunpack.c.0.s8 %v59_v14  ;;  %v73_v18 = vunpack.c.1.s8 %v59_v14  ;;  %v872_v19 = vld [vmem:[%s1245_s2 + $0x8] sm:$0xff]  ;;  %v220_v20 = vld [vmem:[%s1244_s1 + $0x38] sm:$0xff]  ;;  %v227_v25 = vld [vmem:[%s1244_s1 + $0x70] sm:$0xff] }
  0x13   :  { %v871_v26 = vld [vmem:[%s1245_s2] sm:$0xff]  ;;  %v222_v30 = vld [vmem:[%s1244_s1 + $0x48] sm:$0xff]  ;;  %v62_v32 = vunpack.c.2.s8 %v56_v13  ;;  %v63_v33 = vunpack.c.3.s8 %v56_v13  ;;  %v74_v34 = vunpack.c.2.s8 %v59_v14  ;;  %v75_v35 = vunpack.c.3.s8 %v59_v14  ;;  %v224_v36 = vld [vmem:[%s1244_s1 + $0x58] sm:$0xff] }
  0x14   :  { %165 = vmatpush.bf16.msra.mxu0 %v877_v3  ;;  %904 = vmatpush.bf16.msra.mxu3 %v877_v3  ;;  %v76_v21 = vcvt.s32.f32 %v60_v15  ;;  %v77_v22 = vcvt.s32.f32 %v61_v16  ;;  %v88_v23 = vcvt.s32.f32 %v72_v17  ;;  %v89_v24 = vcvt.s32.f32 %v73_v18  ;;  %v221_v29 = vld [vmem:[%s1244_s1 + $0x40] sm:$0xff]  ;;  %v218_v37 = vld [vmem:[%s1244_s1 + $0x28] sm:$0xff]  ;;  %v219_v44 = vld [vmem:[%s1244_s1 + $0x30] sm:$0xff] }
  0x15   :  { %v217_v31 = vld [vmem:[%s1244_s1 + $0x20] sm:$0xff]  ;;  %v78_v38 = vcvt.s32.f32 %v62_v32  ;;  %v79_v39 = vcvt.s32.f32 %v63_v33  ;;  %v90_v40 = vcvt.s32.f32 %v74_v34  ;;  %v91_v41 = vcvt.s32.f32 %v75_v35  ;;  %v57_v45 = vld [vmem:[#allocation2 + $0x8] sm:$0xff]  ;;  %v228_v48 = vld [vmem:[%s1244_s1 + $0x78] sm:$0xff] }
  0x16   :  { %v92_v27 = vpack.c.bf16 %v77_v22, %v76_v21  ;;  %v98_v28 = vpack.c.bf16 %v89_v24, %v88_v23  ;;  %251 = vperm.xlu2 %938, %v217_v31   ;;  %v64_v46 = vunpack.c.0.s8 %v57_v45  ;;  %v65_v47 = vunpack.c.1.s8 %v57_v45  ;;  %v223_v52 = vld [vmem:[%s1244_s1 + $0x50] sm:$0xff]  ;;  %v894_v59 = vld [vmem:[%s1246_s3 + $0x38] sm:$0xff]  ;;  %v892_v2 = vld [vmem:[%s1246_s3 + $0x28] sm:$0xff] }
  0x17   :  { %236 = vperm.xlu0 %936, %v214_v6   ;;  %v93_v42 = vpack.c.bf16 %v79_v39, %v78_v38  ;;  %v99_v43 = vpack.c.bf16 %v91_v41, %v90_v40  ;;  %v66_v53 = vunpack.c.2.s8 %v57_v45  ;;  %v67_v54 = vunpack.c.3.s8 %v57_v45  ;;  %v58_v58 = vld [vmem:[#allocation2 + $0x10] sm:$0xff]  ;;  %579 = vmatpush.bf16.msra.mxu2 %v894_v59  ;;  %v891_v3 = vld [vmem:[%s1246_s3 + $0x20] sm:$0xff]  ;;  %v902_v4 = vld [vmem:[#allocation5 + $0x38] sm:$0xff] }
  0x18   :  { %166 = vmatpush.bf16.msra.mxu0 %v876_v5  ;;  %905 = vmatpush.bf16.msra.mxu3 %v876_v5  ;;  %v80_v49 = vcvt.s32.f32 %v64_v46  ;;  %v81_v50 = vcvt.s32.f32 %v65_v47  ;;  %v68_v60 = vunpack.c.0.s8 %v58_v58  ;;  %v69_v61 = vunpack.c.1.s8 %v58_v58  ;;  %v893_v0 = vld [vmem:[%s1246_s3 + $0x30] sm:$0xff]  ;;  %v900_v13 = vld [vmem:[#allocation5 + $0x28] sm:$0xff]  ;;  %v899_v15 = vld [vmem:[#allocation5 + $0x20] sm:$0xff] }
  0x19   :  { %246 = vperm.xlu1 %937, %v216_v7   ;;  %v82_v55 = vcvt.s32.f32 %v66_v53  ;;  %v83_v56 = vcvt.s32.f32 %v67_v54  ;;  %v70_v5 = vunpack.c.2.s8 %v58_v58  ;;  %v71_v6 = vunpack.c.3.s8 %v58_v58  ;;  %434 = vmatpush.bf16.msra.mxu1 %v902_v4  ;;  %v890_v7 = vld [vmem:[%s1246_s3 + $0x18] sm:$0xff]  ;;  %v888_v14 = vld [vmem:[%s1246_s3 + $0x8] sm:$0xff]  ;;  %v887_v16 = vld [vmem:[%s1246_s3] sm:$0xff] }
  0x1a   :  { %v94_v51 = vpack.c.bf16 %v81_v50, %v80_v49  ;;  %v84_v62 = vcvt.s32.f32 %v68_v60  ;;  %v85_v63 = vcvt.s32.f32 %v69_v61  ;;  %v879_v17 = vld [vmem:[%s1245_s2] sm:$0xff]  ;;  %v898_v18 = vld [vmem:[#allocation5 + $0x18] sm:$0xff]  ;;  %v880_v22 = vld [vmem:[%s1245_s2 + $0x8] sm:$0xff] }
  0x1b   :  { %v95_v57 = vpack.c.bf16 %v83_v56, %v82_v55  ;;  %580 = vmatpush.bf16.msra.mxu2 %v893_v0  ;;  %v895_v21 = vld [vmem:[#allocation5] sm:$0xff] }
  0x1c   :  { %167 = vmatpush.bf16.msra.mxu0 %v875_v8  ;;  %906 = vmatpush.bf16.msra.mxu3 %v875_v8  ;;  %v96_v1 = vpack.c.bf16 %v85_v63, %v84_v62  ;;  %v86_v8 = vcvt.s32.f32 %v70_v5  ;;  %v884_v62 = vld [vmem:[%s1245_s2 + $0x28] sm:$0xff]  ;;  %v885_v63 = vld [vmem:[%s1245_s2 + $0x30] sm:$0xff] }
  0x1e   :  { %256 = vperm.xlu2 %938, %v218_v37   ;;  %v882_v37 = vld [vmem:[%s1245_s2 + $0x18] sm:$0xff] }
  0x1f   :  { %291 = vperm.xlu0 %936, %v225_v10   ;;  %581 = vmatpush.bf16.msra.mxu2 %v892_v2  ;;  %v901_v10 = vld [vmem:[#allocation5 + $0x30] sm:$0xff] }
  0x20   :  { %168 = vmatpush.bf16.msra.mxu0 %v874_v9  ;;  %907 = vmatpush.bf16.msra.mxu3 %v874_v9  ;;  %v87_v9 = vcvt.s32.f32 %v71_v6  ;;  %v886_v6 = vld [vmem:[%s1245_s2 + $0x38] sm:$0xff] }
  0x21   :  { %296 = vperm.xlu1 %937, %v226_v11   ;;  %v889_v11 = vld [vmem:[%s1246_s3 + $0x10] sm:$0xff]  ;;  %435 = vmatpush.bf16.msra.mxu1 %v901_v10 }
  0x23   :  { %582 = vmatpush.bf16.msra.mxu2 %v891_v3 }
  0x24   :  { %169 = vmatpush.bf16.msra.mxu0 %v873_v12  ;;  %908 = vmatpush.bf16.msra.mxu3 %v873_v12  ;;  %v97_v12 = vpack.c.bf16 %v87_v9, %v86_v8 }
  0x25   :  { %436 = vmatpush.bf16.msra.mxu1 %v900_v13 }
  0x26   :  { %261 = vperm.xlu2 %938, %v219_v44  }
  0x27   :  { %266 = vperm.xlu0 %936, %v220_v20   ;;  %583 = vmatpush.bf16.msra.mxu2 %v890_v7  ;;  %v896_v20 = vld [vmem:[#allocation5 + $0x8] sm:$0xff] }
  0x28   :  { %170 = vmatpush.bf16.msra.mxu0 %v872_v19  ;;  %909 = vmatpush.bf16.msra.mxu3 %v872_v19  ;;  %v897_v19 = vld [vmem:[#allocation5 + $0x10] sm:$0xff] }
  0x29   :  { %301 = vperm.xlu1 %937, %v227_v25   ;;  %437 = vmatpush.bf16.msra.mxu1 %v899_v15  ;;  %v881_v25 = vld [vmem:[%s1245_s2 + $0x10] sm:$0xff] }
  0x2b   :  { %584 = vmatpush.bf16.msra.mxu2 %v889_v11 }
  0x2c   :  { %171 = vmatpush.bf16.msra.mxu0 %v871_v26  ;;  %910 = vmatpush.bf16.msra.mxu3 %v871_v26 }
  0x2d   :  { %438 = vmatpush.bf16.msra.mxu1 %v898_v18 }
  0x2e   :  { %306 = vperm.xlu2 %938, %v228_v48  }
  0x2f   :  { %172 = vmatmul.bf16.vlgmr.msra.gmra.mxu0 %v92_v27  ;;  %202 = vmatmul.bf16.vlgmr.msra.gmra.mxu3 %v98_v28 }
  0x30   :  { %271 = vperm.xlu0 %936, %v221_v29   ;;  %911 = vmatpush.bf16.msrb.mxu3 %v902_v4 }
  0x31   :  { %276 = vperm.xlu1 %937, %v222_v30   ;;  %585 = vmatpush.bf16.msra.mxu2 %v888_v14 }
  0x32   :  { %439 = vmatpush.bf16.msra.mxu1 %v897_v19 }
  0x34   :  { %912 = vmatpush.bf16.msrb.mxu3 %v901_v10 }
  0x35   :  { %586 = vmatpush.bf16.msra.mxu2 %v887_v16 }
  0x36   :  { %281 = vperm.xlu2 %938, %v223_v52   ;;  %440 = vmatpush.bf16.msra.mxu1 %v896_v20 }
  0x38   :  { %286 = vperm.xlu0 %936, %v224_v36   ;;  %913 = vmatpush.bf16.msrb.mxu3 %v900_v13 }
  0x39   :  { %587 = vmatmul.bf16.vlgmr.msra.gmra.mxu2 %v879_v17 }
  0x3a   :  { %441 = vmatpush.bf16.msra.mxu1 %v895_v21 }
  0x3c   :  { %914 = vmatpush.bf16.msrb.mxu3 %v899_v15 }
  0x3f   :  { %177 = vmatmul.bf16.gmra.mxu0 %v93_v42  ;;  %207 = vmatmul.bf16.gmra.mxu3 %v99_v43 }
  0x40   :  { %915 = vmatpush.bf16.msrb.mxu3 %v898_v18 }
  0x44   :  { %916 = vmatpush.bf16.msrb.mxu3 %v897_v19 }
  0x48   :  { %917 = vmatpush.bf16.msrb.mxu3 %v896_v20 }
  0x49   :  { %592 = vmatmul.bf16.gmra.mxu2 %v880_v22 }
  0x4c   :  { %918 = vmatpush.bf16.msrb.mxu3 %v895_v21 }
  0x4f   :  { %182 = vmatmul.bf16.gmra.mxu0 %v94_v51  ;;  %v883_v51 = vld [vmem:[%s1245_s2 + $0x20] sm:$0xff]  ;;  %s1050_s2 = smov [#allocation7]  }
  0x50   :  { %919 = vmatpush.bf16.msra.mxu3 %v894_v59  ;;  %s709_s14 = sshll.u32 %s1050_s2, 4  ;;  %s710_s14 = int_to_ptr.vmem [resolvable:$true] %s709_s14 }
  0x54   :  { %920 = vmatpush.bf16.msra.mxu3 %v893_v0 }
  0x58   :  { %921 = vmatpush.bf16.msra.mxu3 %v892_v2 }
  0x59   :  { %597 = vmatmul.bf16.gmra.mxu2 %v881_v25 }
  0x5c   :  { %922 = vmatpush.bf16.msra.mxu3 %v891_v3 }
  0x5f   :  { %187 = vmatmul.bf16.gmra.mxu0 %v95_v57 }
  0x60   :  { %923 = vmatpush.bf16.msra.mxu3 %v890_v7 }
  0x64   :  { %924 = vmatpush.bf16.msra.mxu3 %v889_v11 }
  0x68   :  { %925 = vmatpush.bf16.msra.mxu3 %v888_v14 }
  0x69   :  { %602 = vmatmul.bf16.gmra.mxu2 %v882_v37 }
  0x6c   :  { %926 = vmatpush.bf16.msra.mxu3 %v887_v16 }
  0x6f   :  { %192 = vmatmul.bf16.gmra.mxu0 %v96_v1 }
  0x70   :  { %v252_v26 = vpop.permute.xlu2 %251 }
  0x78   :  { %v257_v34 = vpop.permute.xlu2 %256 }
  0x79   :  { %607 = vmatmul.bf16.gmra.mxu2 %v883_v51 }
  0x7f   :  { %197 = vmatmul.bf16.gmra.mxu0 %v97_v12 }
  0x80   :  { %v262_v44 = vpop.permute.xlu2 %261 }
  0x81   :  { %v232_v23 = vpop.permute.xlu0 %231 }
  0x83   :  { %v242_v24 = vpop.permute.xlu1 %241 }
  0x88   :  { %v307_v52 = vpop.permute.xlu2 %306 }
  0x89   :  { %v237_v28 = vpop.permute.xlu0 %236  ;;  %612 = vmatmul.bf16.gmra.mxu2 %v884_v62 }
  0x8b   :  { %v247_v29 = vpop.permute.xlu1 %246 }
  0x90   :  { %v282_v16 = vpop.permute.xlu2 %281 }
  0x91   :  { %v292_v36 = vpop.permute.xlu0 %291 }
  0x93   :  { %v297_v38 = vpop.permute.xlu1 %296 }
  0x99   :  { %v267_v1 = vpop.permute.xlu0 %266 }
  0x9b   :  { %v302_v50 = vpop.permute.xlu1 %301 }
  0xa2   :  { %v272_v8 = vpop.permute.xlu0 %271 }
  0xa3   :  { %v277_v9 = vpop.permute.xlu1 %276 }
  0xaa   :  { %v287_v15 = vpop.permute.xlu0 %286 }
  0xac   :  { %v173_v27 = vpop.f32.mrf.mxu0 }
  0xad   :  { %v309_v32 = vmul.f32 %v232_v23, %v173_v27 }
  0xb2   :  { %v203_v30 = vpop.f32.mrf.mxu3 }
  0xb3   :  { %v321_v40 = vmul.f32 %v292_v36, %v203_v30 }
  0xb4   :  { %v175_v31 = vpop.f32.mrf.mxu0 }
  0xb5   :  { %v310_v33 = vmul.f32 %v237_v28, %v175_v31 }
  0xb7   :  { %v362_v35 = vpack.c.bf16 %v310_v33, %v309_v32 }
  0xb9   :  { %442 = vmatmul.bf16.vlgmr.msra.gmra.mxu1 %v362_v35 }
  0xba   :  { %v205_v39 = vpop.f32.mrf.mxu3 }
  0xbb   :  { %v322_v41 = vmul.f32 %v297_v38, %v205_v39 }
  0xbc   :  { %v178_v42 = vpop.f32.mrf.mxu0  ;;  %v588_v21 = vpop.f32.mrf.mxu2 }
  0xbd   :  { %v368_v43 = vpack.c.bf16 %v322_v41, %v321_v40  ;;  %v311_v47 = vmul.f32 %v242_v24, %v178_v42 }
  0xbf   :  { %472 = vmatmul.bf16.vlgmr.msrb.gmra.mxu3 %v368_v43 }
  0xc2   :  { %v208_v45 = vpop.f32.mrf.mxu3 }
  0xc3   :  { %v323_v54 = vmul.f32 %v302_v50, %v208_v45 }
  0xc4   :  { %v180_v46 = vpop.f32.mrf.mxu0  ;;  %v590_v22 = vpop.f32.mrf.mxu2 }
  0xc5   :  { %v312_v48 = vmul.f32 %v247_v29, %v180_v46 }
  0xc7   :  { %v363_v49 = vpack.c.bf16 %v312_v48, %v311_v47 }
  0xc9   :  { %447 = vmatmul.bf16.gmra.mxu1 %v363_v49 }
  0xca   :  { %v210_v53 = vpop.f32.mrf.mxu3 }
  0xcb   :  { %v324_v55 = vmul.f32 %v307_v52, %v210_v53 }
  0xcc   :  { %v183_v56 = vpop.f32.mrf.mxu0  ;;  %v593_v23 = vpop.f32.mrf.mxu2 }
  0xcd   :  { %v369_v57 = vpack.c.bf16 %v324_v55, %v323_v54  ;;  %v313_v59 = vmul.f32 %v252_v26, %v183_v56 }
  0xcf   :  { %477 = vmatmul.bf16.gmra.mxu3 %v369_v57 }
  0xd4   :  { %v185_v58 = vpop.f32.mrf.mxu0  ;;  %v595_v27 = vpop.f32.mrf.mxu2 }
  0xd5   :  { %v314_v60 = vmul.f32 %v257_v34, %v185_v58 }
  0xd7   :  { %v364_v61 = vpack.c.bf16 %v314_v60, %v313_v59 }
  0xd9   :  { %452 = vmatmul.bf16.gmra.mxu1 %v364_v61 }
  0xdc   :  { %v188_v0 = vpop.f32.mrf.mxu0  ;;  %v598_v32 = vpop.f32.mrf.mxu2 }
  0xdd   :  { %v315_v3 = vmul.f32 %v262_v44, %v188_v0 }
  0xdf   :  { %617 = vmatmul.bf16.vlgmr.msra.gmra.mxu3 %v885_v63 }
  0xe4   :  { %v190_v2 = vpop.f32.mrf.mxu0  ;;  %v600_v37 = vpop.f32.mrf.mxu2 }
  0xe5   :  { %v316_v4 = vmul.f32 %v267_v1, %v190_v2 }
  0xe7   :  { %v365_v5 = vpack.c.bf16 %v316_v4, %v315_v3 }
  0xe9   :  { %457 = vmatmul.bf16.gmra.mxu1 %v365_v5 }
  0xec   :  { %v193_v7 = vpop.f32.mrf.mxu0  ;;  %v603_v41 = vpop.f32.mrf.mxu2 }
  0xed   :  { %v317_v11 = vmul.f32 %v272_v8, %v193_v7 }
  0xef   :  { %622 = vmatmul.bf16.gmra.mxu3 %v886_v6 }
  0xf4   :  { %v195_v10 = vpop.f32.mrf.mxu0  ;;  %v605_v47 = vpop.f32.mrf.mxu2 }
  0xf5   :  { %v318_v12 = vmul.f32 %v277_v9, %v195_v10 }
  0xf7   :  { %v366_v13 = vpack.c.bf16 %v318_v12, %v317_v11 }
  0xf9   :  { %462 = vmatmul.bf16.gmra.mxu1 %v366_v13 }
  0xfc   :  { %v198_v14 = vpop.f32.mrf.mxu0  ;;  %v608_v53 = vpop.f32.mrf.mxu2 }
  0xfd   :  { %v319_v18 = vmul.f32 %v282_v16, %v198_v14 }
 0x104   :  { %v200_v17 = vpop.f32.mrf.mxu0  ;;  %v610_v58 = vpop.f32.mrf.mxu2 }
 0x105   :  { %v320_v19 = vmul.f32 %v287_v15, %v200_v17 }
 0x107   :  { %v367_v20 = vpack.c.bf16 %v320_v19, %v319_v18 }
 0x109   :  { %467 = vmatmul.bf16.gmra.mxu1 %v367_v20 }
 0x10c   :  { %v613_v12 = vpop.f32.mrf.mxu2 }
 0x136   :  { %v443_v24 = vpop.f32.mrf.mxu1 }
 0x137   :  { %v589_v25 = vadd.f32 %v588_v21, %v443_v24 }
 0x139   :  { %628 = vst [vmem:[#allocation7] sm:$0xff] %v589_v25  ;;  %v665_v62 = vmul.f32 %v589_v25, %v589_v25 }
 0x13e   :  { %v445_v26 = vpop.f32.mrf.mxu1 }
 0x13f   :  { %v591_v28 = vadd.f32 %v590_v22, %v445_v26 }
 0x141   :  { %629 = vst [vmem:[#allocation7 + $0x8] sm:$0xff] %v591_v28  ;;  %v666_v60 = vmul.f32 %v591_v28, %v591_v28  ;;  %v644_v63 = vadd.f32 %v591_v28, %v589_v25 }
 0x142   :  { %v473_v29 = vpop.f32.mrf.mxu3 }
 0x143   :  { %v681_v2 = vadd.f32 %v666_v60, %v665_v62 }
 0x146   :  { %v448_v30 = vpop.f32.mrf.mxu1 }
 0x147   :  { %v594_v31 = vadd.f32 %v593_v23, %v448_v30  ;;  %v615_v30 = vpop.f32.mrf.mxu2 }
 0x149   :  { %630 = vst [vmem:[#allocation7 + $0x10] sm:$0xff] %v594_v31  ;;  %v667_v0 = vmul.f32 %v594_v31, %v594_v31  ;;  %v645_v3 = vadd.f32 %v644_v63, %v594_v31 }
 0x14a   :  { %v475_v33 = vpop.f32.mrf.mxu3 }
 0x14b   :  { %v682_v6 = vadd.f32 %v681_v2, %v667_v0 }
 0x14e   :  { %v450_v34 = vpop.f32.mrf.mxu1 }
 0x14f   :  { %v596_v35 = vadd.f32 %v595_v27, %v450_v34 }
 0x151   :  { %631 = vst [vmem:[#allocation7 + $0x18] sm:$0xff] %v596_v35  ;;  %v668_v4 = vmul.f32 %v596_v35, %v596_v35  ;;  %v646_v7 = vadd.f32 %v645_v3, %v596_v35 }
 0x152   :  { %v478_v36 = vpop.f32.mrf.mxu3 }
 0x153   :  { %v683_v9 = vadd.f32 %v682_v6, %v668_v4 }
 0x156   :  { %v453_v38 = vpop.f32.mrf.mxu1 }
 0x157   :  { %v599_v39 = vadd.f32 %v598_v32, %v453_v38 }
 0x159   :  { %632 = vst [vmem:[#allocation7 + $0x20] sm:$0xff] %v599_v39  ;;  %v669_v8 = vmul.f32 %v599_v39, %v599_v39  ;;  %v647_v10 = vadd.f32 %v646_v7, %v599_v39 }
 0x15a   :  { %v480_v40 = vpop.f32.mrf.mxu3 }
 0x15b   :  { %v684_v13 = vadd.f32 %v683_v9, %v669_v8 }
 0x15e   :  { %v455_v42 = vpop.f32.mrf.mxu1 }
 0x15f   :  { %v601_v43 = vadd.f32 %v600_v37, %v455_v42 }
 0x161   :  { %633 = vst [vmem:[#allocation7 + $0x28] sm:$0xff] %v601_v43  ;;  %v670_v11 = vmul.f32 %v601_v43, %v601_v43  ;;  %v648_v14 = vadd.f32 %v647_v10, %v601_v43 }
 0x162   :  { %v618_v44 = vpop.f32.mrf.mxu3 }
 0x163   :  { %v1216_v45 = vadd.f32 %v618_v44, %v473_v29  ;;  %v685_v17 = vadd.f32 %v684_v13, %v670_v11 }
 0x165   :  { %640 = vst [vmem:[#allocation7 + $0x60] sm:$0xff] %v1216_v45  ;;  %v677_v38 = vmul.f32 %v1216_v45, %v1216_v45 }
 0x166   :  { %v458_v46 = vpop.f32.mrf.mxu1 }
 0x167   :  { %v604_v48 = vadd.f32 %v603_v41, %v458_v46 }
 0x169   :  { %634 = vst [vmem:[#allocation7 + $0x30] sm:$0xff] %v604_v48  ;;  %v671_v15 = vmul.f32 %v604_v48, %v604_v48  ;;  %v649_v18 = vadd.f32 %v648_v14, %v604_v48 }
 0x16a   :  { %v620_v49 = vpop.f32.mrf.mxu3 }
 0x16b   :  { %v1219_v50 = vadd.f32 %v620_v49, %v475_v33  ;;  %v686_v21 = vadd.f32 %v685_v17, %v671_v15 }
 0x16d   :  { %641 = vst [vmem:[#allocation7 + $0x68] sm:$0xff] %v1219_v50  ;;  %v678_v41 = vmul.f32 %v1219_v50, %v1219_v50 }
 0x16e   :  { %v460_v51 = vpop.f32.mrf.mxu1 }
 0x16f   :  { %v606_v52 = vadd.f32 %v605_v47, %v460_v51 }
 0x171   :  { %635 = vst [vmem:[#allocation7 + $0x38] sm:$0xff] %v606_v52  ;;  %v672_v19 = vmul.f32 %v606_v52, %v606_v52  ;;  %v650_v22 = vadd.f32 %v649_v18, %v606_v52 }
 0x172   :  { %v623_v54 = vpop.f32.mrf.mxu3 }
 0x173   :  { %v1222_v55 = vadd.f32 %v623_v54, %v478_v36  ;;  %v687_v24 = vadd.f32 %v686_v21, %v672_v19 }
 0x175   :  { %642 = vst [vmem:[#allocation7 + $0x70] sm:$0xff] %v1222_v55  ;;  %v679_v44 = vmul.f32 %v1222_v55, %v1222_v55 }
 0x176   :  { %v463_v56 = vpop.f32.mrf.mxu1 }
 0x177   :  { %v609_v57 = vadd.f32 %v608_v53, %v463_v56 }
 0x179   :  { %636 = vst [vmem:[#allocation7 + $0x40] sm:$0xff] %v609_v57  ;;  %v673_v23 = vmul.f32 %v609_v57, %v609_v57  ;;  %v651_v25 = vadd.f32 %v650_v22, %v609_v57 }
 0x17a   :  { %v625_v59 = vpop.f32.mrf.mxu3 }
 0x17b   :  { %v626_v61 = vadd.f32 %v625_v59, %v480_v40  ;;  %v688_v27 = vadd.f32 %v687_v24, %v673_v23 }
 0x17d   :  { %643 = vst [vmem:[#allocation7 + $0x78] sm:$0xff] %v626_v61  ;;  %v680_v48 = vmul.f32 %v626_v61, %v626_v61 }
 0x17e   :  { %v465_v1 = vpop.f32.mrf.mxu1 }
 0x17f   :  { %v611_v5 = vadd.f32 %v610_v58, %v465_v1 }
 0x181   :  { %637 = vst [vmem:[#allocation7 + $0x48] sm:$0xff] %v611_v5  ;;  %v674_v26 = vmul.f32 %v611_v5, %v611_v5  ;;  %v652_v28 = vadd.f32 %v651_v25, %v611_v5 }
 0x183   :  { %v689_v32 = vadd.f32 %v688_v27, %v674_v26 }
 0x186   :  { %v468_v16 = vpop.f32.mrf.mxu1 }
 0x187   :  { %v614_v20 = vadd.f32 %v613_v12, %v468_v16 }
 0x189   :  { %638 = vst [vmem:[#allocation7 + $0x50] sm:$0xff] %v614_v20  ;;  %v675_v29 = vmul.f32 %v614_v20, %v614_v20  ;;  %v653_v33 = vadd.f32 %v652_v28, %v614_v20 }
 0x18b   :  { %v690_v35 = vadd.f32 %v689_v32, %v675_v29 }
 0x18e   :  { %v470_v31 = vpop.f32.mrf.mxu1 }
 0x18f   :  { %v616_v34 = vadd.f32 %v615_v30, %v470_v31 }
 0x191   :  { %639 = vst [vmem:[#allocation7 + $0x58] sm:$0xff] %v616_v34  ;;  %v654_v36 = vadd.f32 %v653_v33, %v616_v34  ;;  %v676_v37 = vmul.f32 %v616_v34, %v616_v34 }
 0x192   :  { %717 = dma.vmem_to_hbm [thread:$0]  %s710_s14, 2048, %s712_s17, [#allocation4], %s1044_s29, %s1044_s29, %s1045_s30  }
 0x193   :  { %v655_v39 = vadd.f32 %v654_v36, %v1216_v45  ;;  %v691_v40 = vadd.f32 %v690_v35, %v676_v37  ;;  %s723_s29 = sshll.u32 %s1051_s5, 4  ;;  %s724_s29 = int_to_ptr.vmem [resolvable:$true] %s723_s29 }
 0x195   :  { %v656_v42 = vadd.f32 %v655_v39, %v1219_v50  ;;  %v692_v43 = vadd.f32 %v691_v40, %v677_v38 }
 0x197   :  { %v657_v46 = vadd.f32 %v656_v42, %v1222_v55  ;;  %v693_v47 = vadd.f32 %v692_v43, %v678_v41 }
 0x199   :  { %v658_v49 = vadd.f32 %v657_v46, %v626_v61  ;;  %v694_v51 = vadd.f32 %v693_v47, %v679_v44 }
 0x19b   :  { %v659_v52 = vrot.slane %v658_v49, 4  ;;  %v695_v53 = vadd.f32 %v694_v51, %v680_v48 }
 0x19d   :  { %v660_v54 = vadd.f32 %v659_v52, %v658_v49  ;;  %v696_v45 = vrot.slane %v695_v53, 4 }
 0x19f   :  { %v661_v56 = vrot.slane %v660_v54, 2  ;;  %v697_v57 = vadd.f32 %v696_v45, %v695_v53 }
 0x1a1   :  { %v662_v58 = vadd.f32 %v661_v56, %v660_v54  ;;  %v698_v59 = vrot.slane %v697_v57, 2 }
 0x1a3   :  { %v663_v60 = vrot.slane %v662_v58, 1  ;;  %v699_v50 = vadd.f32 %v698_v59, %v697_v57 }
 0x1a5   :  { %v700_v62 = vrot.slane %v699_v50, 1  ;;  %v664_v55 = vadd.f32 %v663_v60, %v662_v58 }
 0x1a7   :  { %v701_v61 = vadd.f32 %v700_v62, %v699_v50 }
 0x1a9   :  { %v703_v63 = vsel %vm702_vm0, %v664_v55, %v701_v61 }
 0x1aa   :  { %704 = vst [vmem:[#allocation8] sm:$0x3] %v703_v63 }
 0x1ab   :  { %728 = dma.vmem_to_hbm [thread:$0]  %s724_s29, 32, %s726_s19, [#allocation9]  }
 0x1ac   :  { %1039 = dma.done.wait [#allocation4], 2048  }
 0x1ad   :  { %1040 = vsyncadd [#allocation4], 4294965248 }
 0x1ae   :  { %1041 = dma.done.wait [#allocation9], 32  }
 0x1af   :  { %1042 = vsyncadd [#allocation9], 4294967264 }
 0x1b0   :  { %737 = vsyncpa [#allocation3], 1 }
 0x1b1   :  { %738 = vsyncpa [#allocation6], 1 }
 0x1b2   :  { %739 = vsyncpa [#allocation4], 1 }
 0x1b3   :  { %740 = vsyncpa [#allocation9], 1 }

</bundles_post_ra>
